<compile_context>
chip_gen: v7x
topology: tpu7x:2x2x1
jax: 0.10.0
libtpu: 0.0.40
codegen_flags: <defaults>
</compile_context>

<pallas_src>
import functools

import jax
import jax.numpy as jnp
from jax.experimental import pallas as pl
from jax.experimental.pallas import tpu as pltpu

PATCH_H = 4
PATCH_W = 4
HIDDEN = 32
EPS = 1e-6


# ---------------------------------------------------------------------------
# Fused kernel:  channel-magnitude -> normalize -> patch-MLP -> de-normalize
#   x_ref    : (B*C*nh, 4*Wp)   padded image in "patch-row strip" layout
#   m1_ref   : (4*Wp, nw*HIDDEN)   block-diagonal first-layer weight
#   m2_ref   : (nw*HIDDEN, 4*Wp)   block-diagonal second-layer weight
#   bias_ref : (1, nw*HIDDEN + 4*Wp)   [b1_tiled | b2_tiled]
#   out_ref  : (B*nh, 4*Wp)      reconstructed image, same strip layout
# ---------------------------------------------------------------------------
def _recon_kernel(x_ref, m1_ref, m2_ref, bias_ref, out_ref, *,
                  batch, channels, nh, n_pix, split):
    x = x_ref[...]                                     # (B*C*nh, SW) f32
    inv_n = 1.0 / float(n_pix)
    inv_nm1 = 1.0 / float(max(n_pix - 1, 1))           # unbiased std (n-1), guarded

    b1 = bias_ref[:, :split]                           # (1, nw*HIDDEN) lane-aligned
    b2 = bias_ref[:, split:]                           # (1, SW)

    xn_blocks = []
    stats = []
    for b in range(batch):                             # B is tiny & static: unrolled
        # ---- channel magnitude (torch: sqrt((x**2).sum(dim=1)) iff C > 1) ----
        if channels > 1:
            acc = None
            for c in range(channels):
                r0 = (b * channels + c) * nh
                blk = x[r0:r0 + nh, :]                 # (nh, SW) static slice
                acc = blk * blk if acc is None else acc + blk * blk
            mag = jnp.sqrt(acc)                        # (nh, SW)
        else:
            r0 = b * nh
            mag = x[r0:r0 + nh, :]

        # ---- single-pass per-image stats over all (padded) pixels ----
        s1 = jnp.sum(mag, keepdims=True)               # (1,1)
        s2 = jnp.sum(mag * mag, keepdims=True)         # (1,1)
        mean = s1 * inv_n
        var = jnp.maximum(s2 - mean * s1, 0.0) * inv_nm1
        scale = jnp.sqrt(var) + EPS                    # std + eps

        xn_blocks.append((mag - mean) * pl.reciprocal(scale, approx=True))
        stats.append((mean, scale))

    xn = jnp.concatenate(xn_blocks, axis=0)            # (B*nh, SW)

    # ---- per-patch MLP as two batched f32 MXU matmuls.  The patchify /
    #      un-patchify is encoded in the block-diagonal weights, so the input
    #      and output stay in image (strip) layout. ----
    h = jnp.dot(xn, m1_ref[...], preferred_element_type=jnp.float32) + b1
    h = jnp.maximum(h, 0.0)                            # (B*nh, nw*HIDDEN)
    y = jnp.dot(h, m2_ref[...], preferred_element_type=jnp.float32) + b2

    # ---- de-normalize per image and store (single contiguous writeback) ----
    for b in range(batch):
        mean, scale = stats[b]
        out_ref[b * nh:(b + 1) * nh, :] = (
            y[b * nh:(b + 1) * nh, :] * scale + mean).astype(out_ref.dtype)


# ---------------------------------------------------------------------------
# Host-side weight packing: fold patchify/un-patchify into block-diag weights.
#   m1[i*Wp + n*4 + j, m*H + h] = w1[4i+j, h] * (n == m)
#   m2[n*H + h, i*Wp + m*4 + j] = w2[h, 4i+j] * (n == m)
# ---------------------------------------------------------------------------
def _pack_params(w1, b1, w2, b2, nw):
    hd = w1.shape[1]
    eye = jnp.eye(nw, dtype=w1.dtype)
    w1r = w1.reshape(PATCH_H, PATCH_W, hd)                       # [i, j, h]
    m1 = jnp.einsum('ijh,nm->injmh', w1r, eye).reshape(
        PATCH_H * nw * PATCH_W, nw * hd)
    w2r = w2.reshape(hd, PATCH_H, PATCH_W)                       # [h, i, j]
    m2 = jnp.einsum('hij,nm->nhimj', w2r, eye).reshape(
        nw * hd, PATCH_H * nw * PATCH_W)
    b1_big = jnp.tile(b1.reshape(1, hd), (1, nw))                # (1, nw*H)
    b2_big = jnp.tile(b2.reshape(PATCH_H, 1, PATCH_W), (1, nw, 1)).reshape(
        1, PATCH_H * nw * PATCH_W)                               # (1, 4*Wp)
    bias = jnp.concatenate([b1_big, b2_big], axis=1)             # (1, nw*H + 4*Wp)
    return m1, m2, bias


# ---------------------------------------------------------------------------
# Wrapper reproducing ReconNet.forward semantics
# ---------------------------------------------------------------------------
def recon_net_forward(x, w1, b1, w2, b2):
    if x.ndim == 3:                       # x.dim() == 3 -> unsqueeze channel
        x = x[:, None]
    B, C, H, W = x.shape

    # pad to multiples of the patch size (same split as the torch code)
    pad_w = (PATCH_W - W % PATCH_W) % PATCH_W
    pad_h = (PATCH_H - H % PATCH_H) % PATCH_H
    wpad = (pad_w // 2, pad_w - pad_w // 2)
    hpad = (pad_h // 2, pad_h - pad_h // 2)
    xp = jnp.pad(x, ((0, 0), (0, 0), hpad, wpad))
    Hp, Wp = H + pad_h, W + pad_w
    nh, nw = Hp // PATCH_H, Wp // PATCH_W
    sw = PATCH_H * Wp                      # strip width

    # contiguous (free) reshape into the strip layout; no transpose HLOs.
    xs = xp.reshape(B * C * nh, sw)
    m1, m2, bias = _pack_params(w1, b1, w2, b2, nw)   # tiny, weight-side only

    kernel = functools.partial(_recon_kernel, batch=B, channels=C, nh=nh,
                               n_pix=Hp * Wp, split=nw * w1.shape[1])
    vmem = pl.BlockSpec(memory_space=pltpu.MemorySpace.VMEM)
    out_strips = pl.pallas_call(
        kernel,
        out_shape=jax.ShapeDtypeStruct((B * nh, sw), x.dtype),
        in_specs=[vmem, vmem, vmem, vmem],
        out_specs=vmem,
    )(xs, m1, m2, bias)

    # contiguous (free) reshape back to image layout, then crop the padding.
    out = out_strips.reshape(B, 1, Hp, Wp)
    out = out[..., hpad[0]:Hp - hpad[1], wpad[0]:Wp - wpad[1]]
    return out


if __name__ == "__main__":
    key = jax.random.PRNGKey(0)
    kx, k1, k2, k3, k4 = jax.random.split(key, 5)

    # small shapes consistent with the module: B=2, C=4, H=W=16, patch=4
    x = jax.random.normal(kx, (2, 4, 16, 16), dtype=jnp.float32)

    P = PATCH_H * PATCH_W
    w1 = jax.random.normal(k1, (P, HIDDEN), dtype=jnp.float32) * 0.1
    b1 = jax.random.normal(k3, (1, HIDDEN), dtype=jnp.float32) * 0.01
    w2 = jax.random.normal(k2, (HIDDEN, P), dtype=jnp.float32) * 0.1
    b2 = jax.random.normal(k4, (1, P), dtype=jnp.float32) * 0.01

    fwd = jax.jit(recon_net_forward)
    out = jax.block_until_ready(fwd(x, w1, b1, w2, b2))
    assert out.shape == (2, 1, 16, 16), out.shape
    print("KERNEL_OK")
</pallas_src>

<mosaic_0001>
module attributes {stable_mosaic.version = 11 : i64} {
  func.func @_recon_kernel(%arg0: memref<32x64xf32, #tpu.memory_space<vmem>>, %arg1: memref<64x128xf32, #tpu.memory_space<vmem>>, %arg2: memref<128x64xf32, #tpu.memory_space<vmem>>, %arg3: memref<1x192xf32, #tpu.memory_space<vmem>>, %arg4: memref<8x64xf32, #tpu.memory_space<vmem>>) attributes {dimension_semantics = [], scalar_prefetch = 0 : i64, scratch_operands = 0 : i64, tpu.core_type = #tpu.core_type<tc>} {
    %c0 = arith.constant 0 : index
    %c0_0 = arith.constant 0 : index
    %0 = vector.load %arg0[%c0, %c0_0] : memref<32x64xf32, #tpu.memory_space<vmem>>, vector<32x64xf32>
    %c0_1 = arith.constant 0 : index
    %c0_2 = arith.constant 0 : index
    %1 = vector.load %arg3[%c0_1, %c0_2] : memref<1x192xf32, #tpu.memory_space<vmem>>, vector<1x128xf32>
    %c0_3 = arith.constant 0 : index
    %c128 = arith.constant 128 : index
    %2 = vector.load %arg3[%c0_3, %c128] : memref<1x192xf32, #tpu.memory_space<vmem>>, vector<1x64xf32>
    %3 = vector.extract_strided_slice %0 {offsets = [0, 0], sizes = [4, 64], strides = [1, 1]} : vector<32x64xf32> to vector<4x64xf32>
    %4 = arith.mulf %3, %3 : vector<4x64xf32>
    %5 = vector.extract_strided_slice %0 {offsets = [4, 0], sizes = [4, 64], strides = [1, 1]} : vector<32x64xf32> to vector<4x64xf32>
    %6 = arith.mulf %5, %5 : vector<4x64xf32>
    %7 = arith.addf %4, %6 : vector<4x64xf32>
    %8 = vector.extract_strided_slice %0 {offsets = [8, 0], sizes = [4, 64], strides = [1, 1]} : vector<32x64xf32> to vector<4x64xf32>
    %9 = arith.mulf %8, %8 : vector<4x64xf32>
    %10 = arith.addf %7, %9 : vector<4x64xf32>
    %11 = vector.extract_strided_slice %0 {offsets = [12, 0], sizes = [4, 64], strides = [1, 1]} : vector<32x64xf32> to vector<4x64xf32>
    %12 = arith.mulf %11, %11 : vector<4x64xf32>
    %13 = arith.addf %10, %12 : vector<4x64xf32>
    %14 = math.sqrt %13 : vector<4x64xf32>
    %15 = vector.shape_cast %14 : vector<4x64xf32> to vector<1x4x64xf32>
    %cst = arith.constant dense<0.000000e+00> : vector<1xf32>
    %16 = vector.multi_reduction <add>, %15, %cst [1, 2] : vector<1x4x64xf32> to vector<1xf32>
    %17 = vector.shape_cast %16 : vector<1xf32> to vector<1x1x1xf32>
    %18 = vector.extract %17[0, 0, 0] : f32 from vector<1x1x1xf32>
    %19 = vector.broadcast %18 : f32 to vector<1x1xf32>
    %20 = arith.mulf %14, %14 : vector<4x64xf32>
    %21 = vector.shape_cast %20 : vector<4x64xf32> to vector<1x4x64xf32>
    %cst_4 = arith.constant dense<0.000000e+00> : vector<1xf32>
    %22 = vector.multi_reduction <add>, %21, %cst_4 [1, 2] : vector<1x4x64xf32> to vector<1xf32>
    %23 = vector.shape_cast %22 : vector<1xf32> to vector<1x1x1xf32>
    %24 = vector.extract %23[0, 0, 0] : f32 from vector<1x1x1xf32>
    %25 = vector.broadcast %24 : f32 to vector<1x1xf32>
    %cst_5 = arith.constant 3.906250e-03 : f32
    %26 = vector.broadcast %cst_5 : f32 to vector<1x1xf32>
    %27 = arith.mulf %19, %26 : vector<1x1xf32>
    %28 = arith.mulf %27, %19 : vector<1x1xf32>
    %29 = arith.subf %25, %28 : vector<1x1xf32>
    %cst_6 = arith.constant 0.000000e+00 : f32
    %30 = vector.broadcast %cst_6 : f32 to vector<1x1xf32>
    %31 = arith.maximumf %29, %30 : vector<1x1xf32>
    %cst_7 = arith.constant 0.00392156886 : f32
    %32 = vector.broadcast %cst_7 : f32 to vector<1x1xf32>
    %33 = arith.mulf %31, %32 : vector<1x1xf32>
    %34 = math.sqrt %33 : vector<1x1xf32>
    %cst_8 = arith.constant 9.99999997E-7 : f32
    %35 = vector.broadcast %cst_8 : f32 to vector<1x1xf32>
    %36 = arith.addf %34, %35 : vector<1x1xf32>
    %37 = vector.broadcast %27 : vector<1x1xf32> to vector<4x64xf32>
    %38 = arith.subf %14, %37 : vector<4x64xf32>
    %39 = tpu.reciprocal %36 {approx = true} : vector<1x1xf32> -> vector<1x1xf32>
    %40 = vector.broadcast %39 : vector<1x1xf32> to vector<4x64xf32>
    %41 = arith.mulf %38, %40 : vector<4x64xf32>
    %42 = vector.extract_strided_slice %0 {offsets = [16, 0], sizes = [4, 64], strides = [1, 1]} : vector<32x64xf32> to vector<4x64xf32>
    %43 = arith.mulf %42, %42 : vector<4x64xf32>
    %44 = vector.extract_strided_slice %0 {offsets = [20, 0], sizes = [4, 64], strides = [1, 1]} : vector<32x64xf32> to vector<4x64xf32>
    %45 = arith.mulf %44, %44 : vector<4x64xf32>
    %46 = arith.addf %43, %45 : vector<4x64xf32>
    %47 = vector.extract_strided_slice %0 {offsets = [24, 0], sizes = [4, 64], strides = [1, 1]} : vector<32x64xf32> to vector<4x64xf32>
    %48 = arith.mulf %47, %47 : vector<4x64xf32>
    %49 = arith.addf %46, %48 : vector<4x64xf32>
    %50 = vector.extract_strided_slice %0 {offsets = [28, 0], sizes = [4, 64], strides = [1, 1]} : vector<32x64xf32> to vector<4x64xf32>
    %51 = arith.mulf %50, %50 : vector<4x64xf32>
    %52 = arith.addf %49, %51 : vector<4x64xf32>
    %53 = math.sqrt %52 : vector<4x64xf32>
    %54 = vector.shape_cast %53 : vector<4x64xf32> to vector<1x4x64xf32>
    %cst_9 = arith.constant dense<0.000000e+00> : vector<1xf32>
    %55 = vector.multi_reduction <add>, %54, %cst_9 [1, 2] : vector<1x4x64xf32> to vector<1xf32>
    %56 = vector.shape_cast %55 : vector<1xf32> to vector<1x1x1xf32>
    %57 = vector.extract %56[0, 0, 0] : f32 from vector<1x1x1xf32>
    %58 = vector.broadcast %57 : f32 to vector<1x1xf32>
    %59 = arith.mulf %53, %53 : vector<4x64xf32>
    %60 = vector.shape_cast %59 : vector<4x64xf32> to vector<1x4x64xf32>
    %cst_10 = arith.constant dense<0.000000e+00> : vector<1xf32>
    %61 = vector.multi_reduction <add>, %60, %cst_10 [1, 2] : vector<1x4x64xf32> to vector<1xf32>
    %62 = vector.shape_cast %61 : vector<1xf32> to vector<1x1x1xf32>
    %63 = vector.extract %62[0, 0, 0] : f32 from vector<1x1x1xf32>
    %64 = vector.broadcast %63 : f32 to vector<1x1xf32>
    %cst_11 = arith.constant 3.906250e-03 : f32
    %65 = vector.broadcast %cst_11 : f32 to vector<1x1xf32>
    %66 = arith.mulf %58, %65 : vector<1x1xf32>
    %67 = arith.mulf %66, %58 : vector<1x1xf32>
    %68 = arith.subf %64, %67 : vector<1x1xf32>
    %cst_12 = arith.constant 0.000000e+00 : f32
    %69 = vector.broadcast %cst_12 : f32 to vector<1x1xf32>
    %70 = arith.maximumf %68, %69 : vector<1x1xf32>
    %cst_13 = arith.constant 0.00392156886 : f32
    %71 = vector.broadcast %cst_13 : f32 to vector<1x1xf32>
    %72 = arith.mulf %70, %71 : vector<1x1xf32>
    %73 = math.sqrt %72 : vector<1x1xf32>
    %cst_14 = arith.constant 9.99999997E-7 : f32
    %74 = vector.broadcast %cst_14 : f32 to vector<1x1xf32>
    %75 = arith.addf %73, %74 : vector<1x1xf32>
    %76 = vector.broadcast %66 : vector<1x1xf32> to vector<4x64xf32>
    %77 = arith.subf %53, %76 : vector<4x64xf32>
    %78 = tpu.reciprocal %75 {approx = true} : vector<1x1xf32> -> vector<1x1xf32>
    %79 = vector.broadcast %78 : vector<1x1xf32> to vector<4x64xf32>
    %80 = arith.mulf %77, %79 : vector<4x64xf32>
    %81 = tpu.concatenate %41, %80 in 0 : vector<4x64xf32>, vector<4x64xf32> -> vector<8x64xf32>
    %c0_15 = arith.constant 0 : index
    %c0_16 = arith.constant 0 : index
    %82 = vector.load %arg1[%c0_15, %c0_16] : memref<64x128xf32, #tpu.memory_space<vmem>>, vector<64x128xf32>
    %cst_17 = arith.constant dense<0.000000e+00> : vector<8x128xf32>
    %83 = tpu.matmul %81, %82, %cst_17 {dimension_numbers = #tpu.dot_dimension_numbers<[1], [0], [0], [1], [0, 0, 1, 1], [], []>} : vector<8x64xf32>, vector<64x128xf32>, vector<8x128xf32> -> vector<8x128xf32>
    %84 = vector.broadcast %1 : vector<1x128xf32> to vector<8x128xf32>
    %85 = arith.addf %83, %84 : vector<8x128xf32>
    %cst_18 = arith.constant 0.000000e+00 : f32
    %86 = vector.broadcast %cst_18 : f32 to vector<8x128xf32>
    %87 = arith.maximumf %85, %86 : vector<8x128xf32>
    %c0_19 = arith.constant 0 : index
    %c0_20 = arith.constant 0 : index
    %88 = vector.load %arg2[%c0_19, %c0_20] : memref<128x64xf32, #tpu.memory_space<vmem>>, vector<128x64xf32>
    %cst_21 = arith.constant dense<0.000000e+00> : vector<8x64xf32>
    %89 = tpu.matmul %87, %88, %cst_21 {dimension_numbers = #tpu.dot_dimension_numbers<[1], [0], [0], [1], [0, 0, 1, 1], [], []>} : vector<8x128xf32>, vector<128x64xf32>, vector<8x64xf32> -> vector<8x64xf32>
    %90 = vector.broadcast %2 : vector<1x64xf32> to vector<8x64xf32>
    %91 = arith.addf %89, %90 : vector<8x64xf32>
    %92 = vector.extract_strided_slice %91 {offsets = [0, 0], sizes = [4, 64], strides = [1, 1]} : vector<8x64xf32> to vector<4x64xf32>
    %93 = vector.broadcast %36 : vector<1x1xf32> to vector<4x64xf32>
    %94 = arith.mulf %92, %93 : vector<4x64xf32>
    %95 = vector.broadcast %27 : vector<1x1xf32> to vector<4x64xf32>
    %96 = arith.addf %94, %95 : vector<4x64xf32>
    %c0_22 = arith.constant 0 : index
    %c0_23 = arith.constant 0 : index
    %97 = vector.load %arg4[%c0_22, %c0_23] : memref<8x64xf32, #tpu.memory_space<vmem>>, vector<4x64xf32>
    tpu.vector_store %arg4[%c0_22, %c0_23], %96 {strides = array<i32>} : memref<8x64xf32, #tpu.memory_space<vmem>>, vector<4x64xf32>,
    %98 = vector.extract_strided_slice %91 {offsets = [4, 0], sizes = [4, 64], strides = [1, 1]} : vector<8x64xf32> to vector<4x64xf32>
    %99 = vector.broadcast %75 : vector<1x1xf32> to vector<4x64xf32>
    %100 = arith.mulf %98, %99 : vector<4x64xf32>
    %101 = vector.broadcast %66 : vector<1x1xf32> to vector<4x64xf32>
    %102 = arith.addf %100, %101 : vector<4x64xf32>
    %c4 = arith.constant 4 : index
    %c0_24 = arith.constant 0 : index
    %103 = vector.load %arg4[%c4, %c0_24] : memref<8x64xf32, #tpu.memory_space<vmem>>, vector<4x64xf32>
    tpu.vector_store %arg4[%c4, %c0_24], %102 {strides = array<i32>} : memref<8x64xf32, #tpu.memory_space<vmem>>, vector<4x64xf32>,
    return
  }
}

</mosaic_0001>

<bundles_post_ra>
// kernel: recon_net_forward.1
= control target key start
LH: loop header
LB: loop body
LE: loop exit
PB: predicated region body
PF: predicated region fallthrough
CT: control target
= control target key end

     0   :  { %vm41_vm3 = vcmask 519168   ;;  %v477_v34 = vmov 0.0|0.0   ;;  %vm478_vm5 = vmmov 0   ;;  %v479_v38 = vmov 0.0   ;;  %s635_s0 = inlined_call_operand.vmem [shape: f32[32,64], index: 0, kind: input, shape index: {}]   ;;  %s636_s1 = inlined_call_operand.vmem [shape: f32[64,128], index: 1, kind: input, shape index: {}]   ;;  %s637_s2 = inlined_call_operand.vmem [shape: f32[128,64], index: 2, kind: input, shape index: {}]   ;;  %s638_s3 = inlined_call_operand.vmem [shape: f32[1,192], index: 3, kind: input, shape index: {}]   ;;  %s639_s4 = inlined_call_operand.vmem [shape: f32[8,64], index: 4, kind: output, shape index: {}]  }
   0x1   :  { %v19_v0 = vld [vmem:[%s635_s0 + $0x10] sm:$0xff]  ;;  %v20_v1 = vld [vmem:[%s635_s0 + $0x18] sm:$0xff]  ;;  %v17_v2 = vld [vmem:[%s635_s0] sm:$0xff]  ;;  %418 = vmatprep.subr.bf16.mxu0 %v477_v34  ;;  %380 = vmatprep.mubr.msk.f32.mxu0 %vm478_vm5, %v479_v38  ;;  %vm141_vm10 = vcmask 1043456   ;;  %vm157_vm11 = vcmask 523264   ;;  %vm329_vm12 = vcmask 523268  }
   0x2   :  { %v81_v3 = vmul.f32 %v19_v0, %v19_v0  ;;  %v86_v4 = vmul.f32 %v20_v1, %v20_v1  ;;  %v18_v5 = vld [vmem:[%s635_s0 + $0x8] sm:$0xff]  ;;  %v23_v6 = vmul.f32 %v17_v2, %v17_v2  ;;  %v143_v35 = vld [vmem:[%s636_s1] sm:$0xff]  ;;  %v145_v37 = vld [vmem:[%s636_s1 + $0x10] sm:$0xff]  ;;  %430 = vmatprep.subr.bf16.mxu1 %v477_v34  ;;  %415 = vmatprep.mubr.msk.f32.mxu1 %vm478_vm5, %v479_v38 }
   0x3   :  { %v28_v7 = vmul.f32 %v18_v5, %v18_v5  ;;  %v144_v36 = vld [vmem:[%s636_s1 + $0x8] sm:$0xff]  ;;  %v146_v40 = vld [vmem:[%s636_s1 + $0x18] sm:$0xff]  ;;  %v147_v42 = vld [vmem:[%s636_s1 + $0x20] sm:$0xff] }
   0x4   :  { %v83_v8 = vrot.slane %v81_v3, 4  ;;  %v25_v9 = vrot.slane %v23_v6, 4  ;;  %v89_v11 = vrot.slane %v86_v4, 4  ;;  %v419_v39 = vpack.c.bf16 %v144_v36, %v143_v35  ;;  %v148_v43 = vld [vmem:[%s636_s1 + $0x28] sm:$0xff]  ;;  %v149_v45 = vld [vmem:[%s636_s1 + $0x30] sm:$0xff]  ;;  %v150_v46 = vld [vmem:[%s636_s1 + $0x38] sm:$0xff] }
   0x5   :  { %v31_v13 = vrot.slane %v28_v7, 4  ;;  %v422_v41 = vpack.c.bf16 %v146_v40, %v145_v37  ;;  %v425_v44 = vpack.c.bf16 %v148_v43, %v147_v42  ;;  %v428_v47 = vpack.c.bf16 %v150_v46, %v149_v45  ;;  %v232_v48 = vld [vmem:[%s637_s2] sm:$0xff]  ;;  %v233_v49 = vld [vmem:[%s637_s2 + $0x8] sm:$0xff]  ;;  %v234_v50 = vld [vmem:[%s637_s2 + $0x10] sm:$0xff] }
   0x6   :  { %v85_v10 = vadd.f32 %v83_v8, %v81_v3  ;;  %v27_v12 = vadd.f32 %v25_v9, %v23_v6  ;;  %420 = vmatpush3.bf16.msra.mxu0 %v419_v39  ;;  %v431_v51 = vpack.c.bf16 %v233_v49, %v232_v48  ;;  %v235_v52 = vld [vmem:[%s637_s2 + $0x18] sm:$0xff]  ;;  %v236_v54 = vld [vmem:[%s637_s2 + $0x20] sm:$0xff]  ;;  %v237_v55 = vld [vmem:[%s637_s2 + $0x28] sm:$0xff] }
   0x7   :  { %421 = vmatprep.subr.bf16.mxu0 %v477_v34  ;;  %v434_v53 = vpack.c.bf16 %v235_v52, %v234_v50  ;;  %v437_v56 = vpack.c.bf16 %v237_v55, %v236_v54  ;;  %v238_v57 = vld [vmem:[%s637_s2 + $0x30] sm:$0xff]  ;;  %v239_v58 = vld [vmem:[%s637_s2 + $0x38] sm:$0xff]  ;;  %v240_v60 = vld [vmem:[%s637_s2 + $0x40] sm:$0xff] }
   0x8   :  { %v87_v14 = vadd.f32 %v86_v4, %v85_v10  ;;  %v29_v15 = vadd.f32 %v28_v7, %v27_v12  ;;  %432 = vmatpush3.bf16.msra.mxu1 %v431_v51  ;;  %v440_v59 = vpack.c.bf16 %v239_v58, %v238_v57  ;;  %v241_v61 = vld [vmem:[%s637_s2 + $0x48] sm:$0xff]  ;;  %v242_v3 = vld [vmem:[%s637_s2 + $0x50] sm:$0xff]  ;;  %v243_v4 = vld [vmem:[%s637_s2 + $0x58] sm:$0xff] }
   0x9   :  { %433 = vmatprep.subr.bf16.mxu1 %v477_v34  ;;  %v443_v1 = vpack.c.bf16 %v241_v61, %v240_v60 }
   0xa   :  { %v91_v16 = vadd.f32 %v89_v11, %v87_v14  ;;  %v33_v17 = vadd.f32 %v31_v13, %v29_v15  ;;  %423 = vmatpush3.bf16.msra.mxu0 %v422_v41  ;;  %v446_v11 = vpack.c.bf16 %v243_v4, %v242_v3  ;;  %v244_v14 = vld [vmem:[%s637_s2 + $0x60] sm:$0xff]  ;;  %v245_v15 = vld [vmem:[%s637_s2 + $0x68] sm:$0xff] }
   0xb   :  { %424 = vmatprep.subr.bf16.mxu0 %v477_v34 }
   0xc   :  { %465 = vrsqrt.f32 %v91_v16  ;;  %vm94_vm0 = vcmp.eq.f32.partialorder %v91_v16, inf  ;;  %v97_v19 = vand.u32 2147483648, %v91_v16  ;;  %vm96_vm1 = vcmp.eq.f32.partialorder %v91_v16, 0.0  ;;  %435 = vmatpush3.bf16.msra.mxu1 %v434_v53 }
   0xd   :  { %467 = vrsqrt.f32 %v33_v17  ;;  %vm36_vm2 = vcmp.eq.f32.partialorder %v33_v17, inf  ;;  %v39_v22 = vand.u32 2147483648, %v33_v17  ;;  %vm38_vm4 = vcmp.eq.f32.partialorder %v33_v17, 0.0  ;;  %436 = vmatprep.subr.bf16.mxu1 %v477_v34 }
   0xe   :  { %426 = vmatpush3.bf16.msra.mxu0 %v425_v44 }
   0xf   :  { %427 = vmatprep.subr.bf16.mxu0 %v477_v34 }
  0x10   :  { %438 = vmatpush3.bf16.msra.mxu1 %v437_v56 }
  0x11   :  { %439 = vmatprep.subr.bf16.mxu1 %v477_v34 }
  0x12   :  { %429 = vmatpush3.bf16.msra.mxu0 %v428_v47 }
  0x14   :  { %441 = vmatpush3.bf16.msra.mxu1 %v440_v59 }
  0x15   :  { %442 = vmatprep.subr.bf16.mxu1 %v477_v34 }
  0x16   :  { %v466_v18 = vpop.eup %465 }
  0x17   :  { %v468_v20 = vpop.eup %467  ;;  %v93_v21 = vmul.f32 %v466_v18, %v91_v16 }
  0x18   :  { %v35_v23 = vmul.f32 %v468_v20, %v33_v17  ;;  %444 = vmatpush3.bf16.msra.mxu1 %v443_v1 }
  0x19   :  { %v95_v24 = vsel %vm94_vm0, %v91_v16, %v93_v21  ;;  %445 = vmatprep.subr.bf16.mxu1 %v477_v34  ;;  %v449_v21 = vpack.c.bf16 %v245_v15, %v244_v14 }
  0x1a   :  { %v517_v25 = vsel %vm96_vm1, %v97_v19, %v95_v24  ;;  %v37_v26 = vsel %vm36_vm2, %v33_v17, %v35_v23 }
  0x1b   :  { %v99_v27 = vsel %vm41_vm3, %v517_v25, 0.0  ;;  %v521_v28 = vsel %vm38_vm4, %v39_v22, %v37_v26  ;;  %v110_v29 = vmul.f32 %v517_v25, %v517_v25 }
  0x1c   :  { %100 = vadd.xlane.f32.xlu1 %v99_v27  ;;  %v42_v30 = vsel %vm41_vm3, %v521_v28, 0.0  ;;  %v53_v31 = vmul.f32 %v521_v28, %v521_v28  ;;  %447 = vmatpush3.bf16.msra.mxu1 %v446_v11  ;;  %v337_v11 = vld [vmem:[%s638_s3 + $0x1] ss:$0 sm:$0xff] }
  0x1d   :  { %43 = vadd.xlane.f32.xlu0 %v42_v30  ;;  %v111_v32 = vsel %vm41_vm3, %v110_v29, 0.0  ;;  %448 = vmatprep.subr.bf16.mxu1 %v477_v34 }
  0x1e   :  { %v54_v33 = vsel %vm41_vm3, %v53_v31, 0.0 }
  0x20   :  { %112 = vadd.xlane.f32.xlu1 %v111_v32  ;;  %450 = vmatpush3.bf16.msra.mxu1 %v449_v21 }
  0x21   :  { %55 = vadd.xlane.f32.xlu0 %v54_v33  ;;  %451 = vmatprep.subr.bf16.mxu1 %v477_v34 }
  0xa9   :  { %v101_v62 = vpop.xlane.xlu1 %100 }
  0xaa   :  { %v102_v63 = vrot.slane %v101_v62, 4  ;;  %v44_v0 = vpop.xlane.xlu0 %43 }
  0xab   :  { %v45_v2 = vrot.slane %v44_v0, 4 }
  0xac   :  { %v103_v5 = vadd.f32 %v102_v63, %v101_v62 }
  0xad   :  { %v46_v6 = vadd.f32 %v45_v2, %v44_v0  ;;  %v113_v7 = vpop.xlane.xlu1 %112 }
  0xae   :  { %v104_v8 = vrot.slane %v103_v5, 2  ;;  %v114_v9 = vrot.slane %v113_v7, 4  ;;  %v56_v10 = vpop.xlane.xlu0 %55 }
  0xaf   :  { %v47_v12 = vrot.slane %v46_v6, 2  ;;  %v57_v13 = vrot.slane %v56_v10, 4 }
  0xb0   :  { %v115_v16 = vadd.f32 %v114_v9, %v113_v7  ;;  %v105_v20 = vadd.f32 %v104_v8, %v103_v5  ;;  %v246_v5 = vld [vmem:[%s637_s2 + $0x70] sm:$0xff] }
  0xb1   :  { %v58_v17 = vadd.f32 %v57_v13, %v56_v10  ;;  %v48_v18 = vadd.f32 %v47_v12, %v46_v6  ;;  %v247_v6 = vld [vmem:[%s637_s2 + $0x78] sm:$0xff] }
  0xb2   :  { %v116_v19 = vrot.slane %v115_v16, 2  ;;  %v106_v29 = vrot.slane %v105_v20, 1 }
  0xb3   :  { %v59_v22 = vrot.slane %v58_v17, 2  ;;  %v49_v23 = vrot.slane %v48_v18, 1 }
  0xb4   :  { %v117_v24 = vadd.f32 %v116_v19, %v115_v16  ;;  %v107_v35 = vadd.f32 %v106_v29, %v105_v20 }
  0xb5   :  { %v60_v26 = vadd.f32 %v59_v22, %v58_v17  ;;  %v50_v27 = vadd.f32 %v49_v23, %v48_v18 }
  0xb6   :  { %v118_v30 = vrot.slane %v117_v24, 1 }
  0xb7   :  { %454 = vpush %v50_v27  ;;  %v61_v31 = vrot.slane %v60_v26, 1 }
  0xb8   :  { %v119_v33 = vadd.f32 %v118_v30, %v117_v24 }
  0xb9   :  { %v62_v32 = vadd.f32 %v61_v31, %v60_v26 }
  0xbb   :  { %456 = vpush %v62_v32 }
  0xbc   :  { %458 = vpush %v107_v35 }
  0xbd   :  { %460 = vpush %v119_v33 }
  0xe8   :  { %s455_s12 = spop %454 }
  0xe9   :  { %v52_v36 = vstv %s455_s12 }
  0xea   :  { %v609_v37 = vmul.f32 0.00390625, %v52_v36 }
  0xec   :  { %v66_v38 = vmul.f32 %v609_v37, %v52_v36  ;;  %s457_s13 = spop %456  ;;  %v78_v0 = vsub.f32 %v521_v28, %v609_v37  ;;  %v335_v28 = vld [vmem:[%s638_s3] ss:$0 sm:$0xff] }
  0xed   :  { %v64_v39 = vstv %s457_s13  ;;  %s459_s14 = spop %458 }
  0xee   :  { %v67_v40 = vsub.f32 %v64_v39, %v66_v38  ;;  %v109_v41 = vstv %s459_s14  ;;  %s461_s15 = spop %460 }
  0xef   :  { %v122_v42 = vmul.f32 0.00390625, %v109_v41  ;;  %v121_v45 = vstv %s461_s15 }
  0xf0   :  { %v68_v34 = vmax.f32 %v67_v40, 0.0 }
  0xf1   :  { %v123_v43 = vmul.f32 %v122_v42, %v109_v41  ;;  %v135_v62 = vsub.f32 %v517_v25, %v122_v42  ;;  %v452_v25 = vpack.c.bf16 %v247_v6, %v246_v5 }
  0xf2   :  { %v69_v44 = vmul.f32 0.003921569, %v68_v34 }
  0xf3   :  { %v124_v46 = vsub.f32 %v121_v45, %v123_v43  ;;  %453 = vmatpush3.bf16.msra.mxu1 %v452_v25 }
  0xf4   :  { %469 = vrsqrt.f32 %v69_v44  ;;  %vm72_vm6 = vcmp.eq.f32.partialorder %v69_v44, inf  ;;  %v75_v51 = vand.u32 2147483648, %v69_v44  ;;  %vm74_vm7 = vcmp.eq.f32.partialorder %v69_v44, 0.0 }
  0xf5   :  { %v125_v47 = vmax.f32 %v124_v46, 0.0 }
  0xf7   :  { %v126_v48 = vmul.f32 0.003921569, %v125_v47 }
  0xf9   :  { %471 = vrsqrt.f32 %v126_v48  ;;  %vm129_vm8 = vcmp.eq.f32.partialorder %v126_v48, inf  ;;  %v132_v56 = vand.u32 2147483648, %v126_v48  ;;  %vm131_vm9 = vcmp.eq.f32.partialorder %v126_v48, 0.0 }
  0xfe   :  { %v470_v49 = vpop.eup %469 }
  0xff   :  { %v71_v50 = vmul.f32 %v470_v49, %v69_v44 }
 0x101   :  { %v73_v52 = vsel %vm72_vm6, %v69_v44, %v71_v50 }
 0x102   :  { %v76_v53 = vsel %vm74_vm7, %v75_v51, %v73_v52 }
 0x103   :  { %v472_v54 = vpop.eup %471  ;;  %v77_v57 = vadd.f32 1e-06, %v76_v53 }
 0x104   :  { %v128_v55 = vmul.f32 %v472_v54, %v126_v48 }
 0x105   :  { %473 = vrcp.f32 %v77_v57 }
 0x106   :  { %v130_v58 = vsel %vm129_vm8, %v126_v48, %v128_v55 }
 0x107   :  { %v133_v59 = vsel %vm131_vm9, %v132_v56, %v130_v58 }
 0x108   :  { %v134_v60 = vadd.f32 1e-06, %v133_v59 }
 0x10a   :  { %475 = vrcp.f32 %v134_v60 }
 0x10f   :  { %v474_v61 = vpop.eup %473 }
 0x110   :  { %v80_v2 = vmul.f32 %v474_v61, %v78_v0 }
 0x114   :  { %v476_v63 = vpop.eup %475 }
 0x115   :  { %v137_v1 = vmul.f32 %v476_v63, %v135_v62 }
 0x117   :  { %v139_v3 = vrot.slane %v137_v1, 4 }
 0x119   :  { %v142_v4 = vsel %vm141_vm10, %v80_v2, %v139_v3 }
 0x11a   :  { %381 = vmatmul.mubr.msk.f32.vlgmr.msra.gmra.mrb[0].mxu0 %vm157_vm11, %v142_v4 }
 0x1ed   :  { %v227_v7 = vpop.f32.mrb[0].mxu0 }
 0x1ee   :  { %v228_v8 = vadd.f32 %v335_v28, %v227_v7  ;;  %v382_v9 = vpop.f32.mrb[1].mxu0 }
 0x1f0   :  { %v231_v10 = vmax.f32 %v228_v8, 0.0 }
 0x1f2   :  { %416 = vmatmul.mubr.f32.vlgmr.msra.gmra.mrb[0].mxu1 %v231_v10 }
 0x2c5   :  { %v320_v12 = vpop.f32.mrb[0].mxu1 }
 0x2c6   :  { %v321_v13 = vadd.f32 %v337_v11, %v320_v12  ;;  %v417_v14 = vpop.f32.mrb[1].mxu1 }
 0x2c8   :  { %v324_v15 = vmul.f32 %v321_v13, %v77_v57  ;;  %v327_v16 = vmul.f32 %v321_v13, %v134_v60 }
 0x2ca   :  { %v325_v17 = vadd.f32 %v324_v15, %v609_v37  ;;  %v328_v18 = vadd.f32 %v327_v16, %v122_v42 }
 0x2cc   :  { %326 = vst.msk [vmem:[%s639_s4] sm:$0xf] %vm41_vm3, %v325_v17 }
 0x2cd   :  { %330 = vst.msk [vmem:[%s639_s4] sm:$0xf0] %vm329_vm12, %v328_v18 }

</bundles_post_ra>
